<compile_context>
chip_gen: v7x
topology: tpu7x:2x2x1
jax: 0.10.0
libtpu: 0.0.40
codegen_flags: <defaults>
</compile_context>

<pallas_src>
import functools
import math

import jax
import jax.numpy as jnp
from jax import lax
from jax.experimental import pallas as pl
from jax.experimental.pallas import tpu as pltpu


def mha_kernel(x_ref, wq_ref, wk_ref, wv_ref, wo_ref, bo_ref, o_ref, acc_ref):
    h = pl.program_id(1)

    @pl.when(h == 0)
    def _():
        acc_ref[...] = jnp.zeros_like(acc_ref)

    x = x_ref[...]                                                     # (Tp, Dp) bf16

    # Per-head QKV projections (qkv_bias=False). 1/sqrt(head_dim) is already
    # folded into W_query by the wrapper.
    q = jnp.dot(x, wq_ref[...], preferred_element_type=jnp.float32)   # (Tp, hdp)
    k = jnp.dot(x, wk_ref[...], preferred_element_type=jnp.float32)
    v = jnp.dot(x, wv_ref[...], preferred_element_type=jnp.float32)

    qb = q.astype(jnp.bfloat16)
    kb = k.astype(jnp.bfloat16)
    vb = v.astype(jnp.bfloat16)

    # scores = q @ k.T without materializing the transpose (MXU takes it directly).
    s = lax.dot_general(qb, kb, (((1,), (1,)), ((), ())),
                        preferred_element_type=jnp.float32)            # (Tp, Tp) f32

    t = s.shape[0]
    row = lax.broadcasted_iota(jnp.int32, (t, t), 0)
    col = lax.broadcasted_iota(jnp.int32, (t, t), 1)
    # Large finite negative instead of -inf: exp underflows to exactly 0, and
    # fully-masked (padded) rows can never produce (-inf)-(-inf)=NaN.
    s = jnp.where(col > row, jnp.float32(-1e30), s)

    # Softmax in f32; normalization via approximate reciprocal (EUP slot).
    m = jnp.max(s, axis=-1, keepdims=True)
    e = jnp.exp(s - m)
    p = e * pl.reciprocal(jnp.sum(e, axis=-1, keepdims=True), approx=True)
    # TODO(synk): nn.Dropout on attention weights is identity here (eval mode / p=0).

    ctx = jnp.dot(p.astype(jnp.bfloat16), vb,
                  preferred_element_type=jnp.float32)                  # (Tp, hdp)

    # Partial output projection for this head (contraction = padded head_dim >= 128),
    # accumulated in an f32 VMEM scratch that persists across the head axis.
    acc_ref[...] += jnp.dot(ctx.astype(jnp.bfloat16), wo_ref[...],
                            preferred_element_type=jnp.float32)        # (Tp, Do)

    @pl.when(h == pl.num_programs(1) - 1)
    def _():
        o_ref[...] = (acc_ref[...] + bo_ref[...]).astype(o_ref.dtype)


def _round_up(n, m):
    return ((n + m - 1) // m) * m


def multi_head_attention(x, wq, wk, wv, wo, bo, *, num_heads):
    """Causal MHA forward.

    x : (b, T, d_in)              activations (float32)
    wq/wk/wv : (d_in, d_out)      nn.Linear weights pre-transposed (x @ W)
    wo : (d_out, d_out)           out_proj weight pre-transposed
    bo : (d_out,)                 out_proj bias
    """
    b, T, d_in = x.shape
    d_out = wq.shape[1]
    assert d_out % num_heads == 0, "d_out must be divisible by num_heads"
    hd = d_out // num_heads

    # Lane/sublane-dense padded sizes.
    Tp = _round_up(T, 8)
    Dp = _round_up(d_in, 128)
    hdp = _round_up(hd, 128)
    Hi = num_heads * hdp
    Do = _round_up(d_out, 128)

    f32, bf16 = jnp.float32, jnp.bfloat16
    scale = 1.0 / math.sqrt(hd)

    # Zero-padded, bf16-cast activations.
    xp = jnp.zeros((b, Tp, Dp), f32).at[:, :T, :d_in].set(x.astype(f32)).astype(bf16)

    def pad_proj(w, s=1.0):
        # (d_in, d_out) -> (Dp, num_heads*hdp), head blocks along the lane dim.
        w3 = w.reshape(d_in, num_heads, hd).astype(f32) * s
        return (jnp.zeros((Dp, num_heads, hdp), f32)
                .at[:d_in, :, :hd].set(w3)
                .reshape(Dp, Hi).astype(bf16))

    wq_p = pad_proj(wq, scale)      # fold softmax scale into W_query (free)
    wk_p = pad_proj(wk)
    wv_p = pad_proj(wv)

    wo3 = wo.reshape(num_heads, hd, d_out).astype(f32)
    wo_p = (jnp.zeros((num_heads, hdp, Do), f32)
            .at[:, :hd, :d_out].set(wo3)
            .reshape(Hi, Do).astype(bf16))
    bo_p = jnp.zeros((1, Do), f32).at[:, :d_out].set(bo.reshape(1, d_out).astype(f32))

    out = pl.pallas_call(
        mha_kernel,
        out_shape=jax.ShapeDtypeStruct((b, Tp, Do), f32),
        grid=(b, num_heads),
        in_specs=[
            pl.BlockSpec((None, Tp, Dp), lambda i, h: (i, 0, 0)),   # x: one batch row
            pl.BlockSpec((Dp, hdp), lambda i, h: (0, h)),           # W_query (head h)
            pl.BlockSpec((Dp, hdp), lambda i, h: (0, h)),           # W_key   (head h)
            pl.BlockSpec((Dp, hdp), lambda i, h: (0, h)),           # W_value (head h)
            pl.BlockSpec((hdp, Do), lambda i, h: (h, 0)),           # out_proj rows of head h
            pl.BlockSpec((1, Do), lambda i, h: (0, 0)),             # out_proj bias
        ],
        out_specs=pl.BlockSpec((None, Tp, Do), lambda i, h: (i, 0, 0)),
        scratch_shapes=[pltpu.VMEM((Tp, Do), jnp.float32)],
        compiler_params=pltpu.CompilerParams(
            dimension_semantics=("parallel", "arbitrary"),
            vmem_limit_bytes=32 * 1024 * 1024,
        ),
    )(xp, wq_p, wk_p, wv_p, wo_p, bo_p)

    return out[:, :T, :d_out].astype(x.dtype)


def reference_mha(x, wq, wk, wv, wo, bo, *, num_heads):
    """Pure-JAX f32 mirror of the PyTorch forward (dropout in eval mode)."""
    b, T, d_in = x.shape
    d_out = wq.shape[1]
    hd = d_out // num_heads
    q = (x @ wq).reshape(b, T, num_heads, hd).transpose(0, 2, 1, 3)
    k = (x @ wk).reshape(b, T, num_heads, hd).transpose(0, 2, 1, 3)
    v = (x @ wv).reshape(b, T, num_heads, hd).transpose(0, 2, 1, 3)
    scores = jnp.einsum("bhqd,bhkd->bhqk", q, k)
    mask = jnp.triu(jnp.ones((T, T), dtype=bool), k=1)
    scores = jnp.where(mask, -jnp.inf, scores)
    w = jax.nn.softmax(scores / math.sqrt(hd), axis=-1)
    ctx = jnp.einsum("bhqk,bhkd->bhqd", w, v).transpose(0, 2, 1, 3).reshape(b, T, d_out)
    return ctx @ wo + bo.reshape(1, d_out)


if __name__ == "__main__":
    # Module hyperparameters (small, consistent with the forward pass).
    batch, seq, d_in, d_out, num_heads = 2, 8, 32, 32, 4

    key = jax.random.PRNGKey(0)
    kx, kq, kk, kv, ko, kb = jax.random.split(key, 6)

    x = jax.random.normal(kx, (batch, seq, d_in), dtype=jnp.float32)

    # nn.Linear(d_in, d_out) weights are (d_out, d_in); stored pre-transposed as
    # (d_in, d_out) so the kernel computes x @ W directly.
    scale_in = 1.0 / math.sqrt(d_in)
    scale_out = 1.0 / math.sqrt(d_out)
    wq = jax.random.uniform(kq, (d_in, d_out), jnp.float32, -scale_in, scale_in)
    wk = jax.random.uniform(kk, (d_in, d_out), jnp.float32, -scale_in, scale_in)
    wv = jax.random.uniform(kv, (d_in, d_out), jnp.float32, -scale_in, scale_in)
    wo = jax.random.uniform(ko, (d_out, d_out), jnp.float32, -scale_out, scale_out)
    bo = jax.random.uniform(kb, (d_out,), jnp.float32, -scale_out, scale_out)

    out = multi_head_attention(x, wq, wk, wv, wo, bo, num_heads=num_heads)
    out = jax.block_until_ready(out)

    ref = reference_mha(x, wq, wk, wv, wo, bo, num_heads=num_heads)
    assert out.shape == (batch, seq, d_out)
    # bf16 matmul operands (f32 accumulation) + approx reciprocal -> loose tolerance.
    assert jnp.allclose(out, ref, atol=3e-2, rtol=3e-2), \
        f"mismatch vs pure-JAX reference: max abs err {jnp.max(jnp.abs(out - ref))}"

    print("KERNEL_OK")
</pallas_src>

<mosaic_0001>
module attributes {stable_mosaic.version = 11 : i64} {
  func.func @mha_kernel(%arg0: i32, %arg1: i32, %arg2: memref<1x8x128xbf16, #tpu.memory_space<vmem>>, %arg3: memref<128x128xbf16, #tpu.memory_space<vmem>>, %arg4: memref<128x128xbf16, #tpu.memory_space<vmem>>, %arg5: memref<128x128xbf16, #tpu.memory_space<vmem>>, %arg6: memref<128x128xbf16, #tpu.memory_space<vmem>>, %arg7: memref<1x128xf32, #tpu.memory_space<vmem>>, %arg8: memref<1x8x128xf32, #tpu.memory_space<vmem>>, %arg9: memref<8x128xf32, #tpu.memory_space<vmem>>) attributes {dimension_semantics = [#tpu.dimension_semantics<parallel>, #tpu.dimension_semantics<arbitrary>], iteration_bounds = array<i64: 2, 4>, scalar_prefetch = 0 : i64, scratch_operands = 1 : i64, tpu.core_type = #tpu.core_type<tc>, window_params = [{transform_indices = @transform_0, window_bounds = array<i64: 1, 8, 128>}, {transform_indices = @transform_1, window_bounds = array<i64: 128, 128>}, {transform_indices = @transform_2, window_bounds = array<i64: 128, 128>}, {transform_indices = @transform_3, window_bounds = array<i64: 128, 128>}, {transform_indices = @transform_4, window_bounds = array<i64: 128, 128>}, {pipeline_mode = #tpu.pipeline_mode<synchronous>, transform_indices = @transform_5, window_bounds = array<i64: 1, 128>}, {transform_indices = @transform_6, window_bounds = array<i64: 1, 8, 128>}]} {
    %c0_i32 = arith.constant 0 : i32
    %0 = arith.cmpi eq, %arg1, %c0_i32 : i32
    %1 = arith.extui %0 : i1 to i32
    %c0_i32_0 = arith.constant 0 : i32
    %2 = arith.cmpi ne, %1, %c0_i32_0 : i32
    scf.if %2 {
      %cst_24 = arith.constant 0.000000e+00 : f32
      %41 = vector.broadcast %cst_24 : f32 to vector<8x128xf32>
      %c0_25 = arith.constant 0 : index
      %c0_26 = arith.constant 0 : index
      %42 = vector.load %arg9[%c0_25, %c0_26] : memref<8x128xf32, #tpu.memory_space<vmem>>, vector<8x128xf32>
      tpu.vector_store %arg9[%c0_25, %c0_26], %41 {strides = array<i32>} : memref<8x128xf32, #tpu.memory_space<vmem>>, vector<8x128xf32>,
    } else {
    }
    %c0 = arith.constant 0 : index
    %c0_1 = arith.constant 0 : index
    %c0_2 = arith.constant 0 : index
    %3 = vector.load %arg2[%c0, %c0_1, %c0_2] : memref<1x8x128xbf16, #tpu.memory_space<vmem>>, vector<1x8x128xbf16>
    %4 = vector.shape_cast %3 : vector<1x8x128xbf16> to vector<8x128xbf16>
    %c0_3 = arith.constant 0 : index
    %c0_4 = arith.constant 0 : index
    %5 = vector.load %arg3[%c0_3, %c0_4] : memref<128x128xbf16, #tpu.memory_space<vmem>>, vector<128x128xbf16>
    %cst = arith.constant dense<0.000000e+00> : vector<8x128xf32>
    %6 = tpu.matmul %4, %5, %cst {dimension_numbers = #tpu.dot_dimension_numbers<[1], [0], [0], [1], [0, 0, 1, 1], [], []>} : vector<8x128xbf16>, vector<128x128xbf16>, vector<8x128xf32> -> vector<8x128xf32>
    %c0_5 = arith.constant 0 : index
    %c0_6 = arith.constant 0 : index
    %7 = vector.load %arg4[%c0_5, %c0_6] : memref<128x128xbf16, #tpu.memory_space<vmem>>, vector<128x128xbf16>
    %cst_7 = arith.constant dense<0.000000e+00> : vector<8x128xf32>
    %8 = tpu.matmul %4, %7, %cst_7 {dimension_numbers = #tpu.dot_dimension_numbers<[1], [0], [0], [1], [0, 0, 1, 1], [], []>} : vector<8x128xbf16>, vector<128x128xbf16>, vector<8x128xf32> -> vector<8x128xf32>
    %c0_8 = arith.constant 0 : index
    %c0_9 = arith.constant 0 : index
    %9 = vector.load %arg5[%c0_8, %c0_9] : memref<128x128xbf16, #tpu.memory_space<vmem>>, vector<128x128xbf16>
    %cst_10 = arith.constant dense<0.000000e+00> : vector<8x128xf32>
    %10 = tpu.matmul %4, %9, %cst_10 {dimension_numbers = #tpu.dot_dimension_numbers<[1], [0], [0], [1], [0, 0, 1, 1], [], []>} : vector<8x128xbf16>, vector<128x128xbf16>, vector<8x128xf32> -> vector<8x128xf32>
    %11 = arith.truncf %6 : vector<8x128xf32> to vector<8x128xbf16>
    %12 = arith.truncf %8 : vector<8x128xf32> to vector<8x128xbf16>
    %13 = arith.truncf %10 : vector<8x128xf32> to vector<8x128xbf16>
    %cst_11 = arith.constant dense<0.000000e+00> : vector<8x8xf32>
    %14 = tpu.matmul %11, %12, %cst_11 {dimension_numbers = #tpu.dot_dimension_numbers<[1], [1], [0], [0], [0, 0, 1, 0], [], []>} : vector<8x128xbf16>, vector<8x128xbf16>, vector<8x8xf32> -> vector<8x8xf32>
    %15 = tpu.iota {dimensions = array<i32: 0>} : vector<8x8xi32>
    %16 = tpu.iota {dimensions = array<i32: 1>} : vector<8x8xi32>
    %17 = arith.cmpi sgt, %16, %15 : vector<8x8xi32>
    %cst_12 = arith.constant -1.000000e+30 : f32
    %18 = vector.broadcast %cst_12 : f32 to vector<8x8xf32>
    %19 = arith.select %17, %18, %14 : vector<8x8xi1>, vector<8x8xf32>
    %cst_13 = arith.constant dense<0xFF800000> : vector<8xf32>
    %20 = vector.multi_reduction <maximumf>, %19, %cst_13 [1] : vector<8x8xf32> to vector<8xf32>
    %21 = vector.shape_cast %20 : vector<8xf32> to vector<8x1xf32>
    %22 = vector.broadcast %21 : vector<8x1xf32> to vector<8x8xf32>
    %23 = arith.subf %19, %22 : vector<8x8xf32>
    %24 = math.exp %23 : vector<8x8xf32>
    %cst_14 = arith.constant dense<0.000000e+00> : vector<8xf32>
    %25 = vector.multi_reduction <add>, %24, %cst_14 [1] : vector<8x8xf32> to vector<8xf32>
    %26 = vector.shape_cast %25 : vector<8xf32> to vector<8x1xf32>
    %27 = tpu.reciprocal %26 {approx = true} : vector<8x1xf32> -> vector<8x1xf32>
    %28 = vector.broadcast %27 : vector<8x1xf32> to vector<8x8xf32>
    %29 = arith.mulf %24, %28 : vector<8x8xf32>
    %30 = arith.truncf %29 : vector<8x8xf32> to vector<8x8xbf16>
    %cst_15 = arith.constant dense<0.000000e+00> : vector<8x128xf32>
    %31 = tpu.matmul %30, %13, %cst_15 {dimension_numbers = #tpu.dot_dimension_numbers<[1], [0], [0], [1], [0, 0, 1, 1], [], []>} : vector<8x8xbf16>, vector<8x128xbf16>, vector<8x128xf32> -> vector<8x128xf32>
    %c0_16 = arith.constant 0 : index
    %c0_17 = arith.constant 0 : index
    %32 = vector.load %arg9[%c0_16, %c0_17] : memref<8x128xf32, #tpu.memory_space<vmem>>, vector<8x128xf32>
    %33 = arith.truncf %31 : vector<8x128xf32> to vector<8x128xbf16>
    %c0_18 = arith.constant 0 : index
    %c0_19 = arith.constant 0 : index
    %34 = vector.load %arg6[%c0_18, %c0_19] : memref<128x128xbf16, #tpu.memory_space<vmem>>, vector<128x128xbf16>
    %cst_20 = arith.constant dense<0.000000e+00> : vector<8x128xf32>
    %35 = tpu.matmul %33, %34, %cst_20 {dimension_numbers = #tpu.dot_dimension_numbers<[1], [0], [0], [1], [0, 0, 1, 1], [], []>} : vector<8x128xbf16>, vector<128x128xbf16>, vector<8x128xf32> -> vector<8x128xf32>
    %36 = arith.addf %32, %35 : vector<8x128xf32>
    %c0_21 = arith.constant 0 : index
    %c0_22 = arith.constant 0 : index
    %37 = vector.load %arg9[%c0_21, %c0_22] : memref<8x128xf32, #tpu.memory_space<vmem>>, vector<8x128xf32>
    tpu.vector_store %arg9[%c0_21, %c0_22], %36 {strides = array<i32>} : memref<8x128xf32, #tpu.memory_space<vmem>>, vector<8x128xf32>,
    %c3_i32 = arith.constant 3 : i32
    %38 = arith.cmpi eq, %arg1, %c3_i32 : i32
    %39 = arith.extui %38 : i1 to i32
    %c0_i32_23 = arith.constant 0 : i32
    %40 = arith.cmpi ne, %39, %c0_i32_23 : i32
    scf.if %40 {
      %c0_24 = arith.constant 0 : index
      %c0_25 = arith.constant 0 : index
      %41 = vector.load %arg9[%c0_24, %c0_25] : memref<8x128xf32, #tpu.memory_space<vmem>>, vector<8x128xf32>
      %c0_26 = arith.constant 0 : index
      %c0_27 = arith.constant 0 : index
      %42 = vector.load %arg7[%c0_26, %c0_27] : memref<1x128xf32, #tpu.memory_space<vmem>>, vector<1x128xf32>
      %43 = vector.broadcast %42 : vector<1x128xf32> to vector<8x128xf32>
      %44 = arith.addf %41, %43 : vector<8x128xf32>
      %c0_28 = arith.constant 0 : index
      %c0_29 = arith.constant 0 : index
      %c0_30 = arith.constant 0 : index
      %45 = vector.load %arg8[%c0_28, %c0_29, %c0_30] : memref<1x8x128xf32, #tpu.memory_space<vmem>>, vector<1x8x128xf32>
      %46 = vector.shape_cast %45 : vector<1x8x128xf32> to vector<8x128xf32>
      %47 = vector.shape_cast %44 : vector<8x128xf32> to vector<1x8x128xf32>
      tpu.vector_store %arg8[%c0_28, %c0_29, %c0_30], %47 {strides = array<i32>} : memref<1x8x128xf32, #tpu.memory_space<vmem>>, vector<1x8x128xf32>,
    } else {
    }
    return
  }
  func.func @transform_0(%arg0: i32, %arg1: i32) -> (i32, i32, i32) {
    %c0_i32 = arith.constant 0 : i32
    %c0_i32_0 = arith.constant 0 : i32
    %c0_i32_1 = arith.constant 0 : i32
    return %arg0, %c0_i32, %c0_i32_0 : i32, i32, i32
  }
  func.func @transform_1(%arg0: i32, %arg1: i32) -> (i32, i32) {
    %c0_i32 = arith.constant 0 : i32
    %c0_i32_0 = arith.constant 0 : i32
    return %c0_i32, %arg1 : i32, i32
  }
  func.func @transform_2(%arg0: i32, %arg1: i32) -> (i32, i32) {
    %c0_i32 = arith.constant 0 : i32
    %c0_i32_0 = arith.constant 0 : i32
    return %c0_i32, %arg1 : i32, i32
  }
  func.func @transform_3(%arg0: i32, %arg1: i32) -> (i32, i32) {
    %c0_i32 = arith.constant 0 : i32
    %c0_i32_0 = arith.constant 0 : i32
    return %c0_i32, %arg1 : i32, i32
  }
  func.func @transform_4(%arg0: i32, %arg1: i32) -> (i32, i32) {
    %c0_i32 = arith.constant 0 : i32
    %c0_i32_0 = arith.constant 0 : i32
    return %arg1, %c0_i32 : i32, i32
  }
  func.func @transform_5(%arg0: i32, %arg1: i32) -> (i32, i32) {
    %c0_i32 = arith.constant 0 : i32
    %c0_i32_0 = arith.constant 0 : i32
    %c0_i32_1 = arith.constant 0 : i32
    return %c0_i32, %c0_i32_0 : i32, i32
  }
  func.func @transform_6(%arg0: i32, %arg1: i32) -> (i32, i32, i32) {
    %c0_i32 = arith.constant 0 : i32
    %c0_i32_0 = arith.constant 0 : i32
    %c0_i32_1 = arith.constant 0 : i32
    return %arg0, %c0_i32, %c0_i32_0 : i32, i32, i32
  }
}

</mosaic_0001>

<bundles_post_ra>
// kernel: tpu_custom_call.1
= control target key start
LH: loop header
LB: loop body
LE: loop exit
PB: predicated region body
PF: predicated region fallthrough
CT: control target
= control target key end

     0   :  { %s2375_s0 = inlined_call_operand.hbm [shape: bf16[2,8,128], index: 0, kind: input, shape index: {}]   ;;  %s2376_s1 = inlined_call_operand.hbm [shape: bf16[128,512], index: 1, kind: input, shape index: {}]   ;;  %s2377_s2 = inlined_call_operand.hbm [shape: bf16[128,512], index: 2, kind: input, shape index: {}]   ;;  %s2378_s3 = inlined_call_operand.hbm [shape: bf16[128,512], index: 3, kind: input, shape index: {}]   ;;  %s2379_s4 = inlined_call_operand.hbm [shape: bf16[512,128], index: 4, kind: input, shape index: {}]   ;;  %s2380_s5 = inlined_call_operand.vmem [shape: f32[1,128], index: 5, kind: input, shape index: {}]   ;;  %s2381_s6 = inlined_call_operand.hbm [shape: f32[2,8,128], index: 6, kind: output, shape index: {}]  }
   0x1   :  { %2410 = sst [smem:[#allocation32_spill]] %s2376_s1 }
   0x2   :  { %2411 = sst [smem:[#allocation33_spill]] %s2378_s3 }
   0x3   :  { %2412 = sst [smem:[#allocation34_spill]] %s2380_s5 }
   0x4   :  { %2413 = sst [smem:[#allocation35_spill]] %s2381_s6 }
   0x5   :  { %11 = vsyncpa [#allocation4], 0 }
   0x6   :  { %13 = vsyncpa [#allocation4 + $0x1], 0 }
   0x7   :  { %14 = vsyncpa [#allocation7], 0 }
   0x8   :  { %16 = vsyncpa [#allocation7 + $0x1], 0 }
   0x9   :  { %17 = vsyncpa [#allocation10], 0 }
   0xa   :  { %19 = vsyncpa [#allocation10 + $0x1], 0 }
   0xb   :  { %20 = vsyncpa [#allocation5], 0 }
   0xc   :  { %22 = vsyncpa [#allocation5 + $0x1], 0  ;;  %s1850_s21 = smov 0   ;;  %s1852_s22 = smov 0  }
   0xd   :  { %s1854_s23 = smov 0   ;;  %s1856_s24 = smov 0  }
   0xe   :  { %s1858_s25 = smov 0   ;;  %s1860_s26 = smov 0  }
   0xf   :  { %s1862_s27 = smov 0   ;;  %s1864_s28 = smov 0  }
  0x10   :  { %s1866_s29 = smov 0   ;;  %s1868_s30 = smov 0  }
  0x11   :  { %s1870_s7 = smov 0  }
  0x12 LB: > { %2414 = sst [smem:[#allocation17_spill]] %s1769_s23  ;;  %p2385_p0 = scmp.eq.s32.totalorder %s1801_s7, 0  ;;  %s1801_s7 = sphi %s1870_s7, %s28_s7   ;;  %s1797_s30 = sphi %s1868_s30, %s2470_s30   ;;  %s1793_s29 = sphi %s1866_s29, %s2476_s29   ;;  %s1789_s28 = sphi %s1864_s28, %s2468_s28   ;;  %s1785_s27 = sphi %s1862_s27, %s2475_s27   ;;  %s1781_s26 = sphi %s1860_s26, %s2467_s26   ;;  %s1777_s25 = sphi %s1858_s25, %s2474_s25   ;;  %s1773_s24 = sphi %s1856_s24, %s2473_s24   ;;  %s1769_s23 = sphi %s1854_s23, %s2465_s23   ;;  %s1765_s22 = sphi %s1852_s22, %s2472_s22   ;;  %s1761_s21 = sphi %s1850_s21, %s2471_s21  }
  0x13   : > { %2415 = sst [smem:[#allocation18_spill]] %s1773_s24  ;;  %p80_p1 = scmp.ne.s32.totalorder %s1769_s23, %s1765_s22 }
  0x14   : > { %2416 = sst [smem:[#allocation19_spill]] %s1781_s26  ;;  %p2384_p2 = scmp.lt.s32.totalorder %s1801_s7, 8 }
  0x15   : > { %2417 = sst [smem:[#allocation20_spill]] %s1785_s27  ;;  %s2383_s9 = sand.u32 1, %s1801_s7  }
  0x16   : > { %2418 = sst [smem:[#allocation21_spill]] %s1789_s28  ;;  %p82_p3 = por %p80_p1, %p2385_p0 }
  0x17   : > { %2419 = sst [smem:[#allocation22_spill]] %s1797_s30  ;;  %s258_s10 = sand.u32 1, %s1769_s23  }
  0x18   : > { %s1915_s11 = sshll.u32 %s1793_s29, 6  ;;  %s1917_s12 = sshll.u32 %s258_s10, 6 }
  0x19   : > { %s2420_s1 = sld [smem:[#allocation32_spill]]  ;;  %p1927_p4 = pnand %p2384_p2, %p82_p3 }
  0x1a   : > { %s260_s17 = scalar_lea.vmem [#allocation6], %s1917_s12  ;;  %s1936_s19 = scalar_lea.sflag [#allocation7], %s2383_s9 }
  0x1b   : > { %s2421_s16 = scalar_select %p1927_p4, 1, 0 }
  0x1c   : > { %s266_s18 = sshll.u32 %s260_s17, 4  ;;  %p1942_p6 = pneg %p1927_p4  ;;  %s1932_s18 = int_to_ptr.vmem [resolvable:$true] %s266_s18 }
  0x1f   : > { %s1923_s15 = scalar_lea.hbm %s2420_s1, %s1915_s11  ;;  %s1526_s17 = scalar_lea.hbm %s2420_s1, 4096 }
  0x20   : > { %s1521_s20 = scalar_lea.hbm %s1923_s15, 1024  ;;  %p1527_p9 = scmp.lt.u32.totalorder %s1923_s15, %s2420_s1 }
  0x21   : > { %p1522_p5 = scmp.ne.s32.totalorder %s1923_s15, %s1521_s20  ;;  %p1528_p10 = scmp.lt.u32.totalorder %s1526_s17, %s1521_s20 }
  0x22   : > { %p1530_p12 = scmp.lt.u32.totalorder %s1521_s20, %s1923_s15 }
  0x23   : > { %p1524_p7 = pnand %p1942_p6, %p1522_p5  ;;  %p1529_p11 = por %p1528_p10, %p1527_p9 }
  0x25   : > { %p1525_p8 = pneg %p1524_p7  ;;  %p1531_p13 = por %p1530_p12, %p1529_p11 }
  0x27   : > { %p1532_p1 = pnand %p1531_p13, %p1525_p8 }
  0x29   : > { %1535 = shalt.err (!%p1532_p1)
}
  0x2a   : > { %s1536_s9 = scalar_lea.vmem %s1932_s18, 1024  ;;  %s1803_s13 = smov [#allocation6]  }
  0x2b   : > { %p1537_p3 = scmp.ne.s32.totalorder %s1932_s18, %s1536_s9  ;;  %s1541_s14 = sshll.u32 %s1803_s13, 4  ;;  %s1542_s14 = int_to_ptr.vmem [resolvable:$false] %s1541_s14 }
  0x2c   : > { %s1543_s6 = scalar_lea.vmem %s1542_s14, 2048  ;;  %p1544_p2 = scmp.lt.s32.totalorder %s1932_s18, %s1542_s14 }
  0x2d   : > { %p1539_p5 = pnand %p1537_p3, %p1942_p6  ;;  %p1545_p0 = scmp.lt.s32.totalorder %s1543_s6, %s1536_s9 }
  0x2f   : > { %p1540_p7 = pneg %p1539_p5  ;;  %p1546_p9 = por %p1545_p0, %p1544_p2 }
  0x31   : > { %p1547_p10 = pnand %p1546_p9, %p1540_p7 }
  0x33   : > { %1550 = shalt.err (!%p1547_p10)
}
  0x34   : > { %s2386_s8 = smov 256   ;;  %s2388_s20 = smov 64  }
  0x35   : > { %s2390_s17 = smov 4   ;;  %p1177_p0 = scmp.ge.s32.totalorder %s1801_s7, 1 }
  0x36   : > { %1375 = dma.hbm_to_vmem [thread:$0]  (!%p1927_p4), %s1923_s15, 1024, %s1932_s18, %s1936_s19, %s2386_s8, %s2388_s20, %s2390_s17  }
  0x37   : > { %p335_p2 = scmp.lt.s32.totalorder %s1801_s7, 9  ;;  %s2425_s3 = sld [smem:[#allocation33_spill]] }
  0x38   : > { %s300_s1 = scalar_lea.vmem [#allocation9], %s1917_s12  ;;  %s2426_s15 = sand.u32 1, %s1801_s7  }
  0x39   : > { %p1971_p8 = pnand %p1177_p0, %p335_p2  ;;  %s306_s28 = sshll.u32 %s300_s1, 4  ;;  %s1982_s28 = int_to_ptr.vmem [resolvable:$true] %s306_s28 }
  0x3a   : > { %s1986_s18 = scalar_lea.sflag [#allocation10], %s2426_s15 }
  0x3b   : > { %s2423_s9 = scalar_select %p1971_p8, 1, 0 }
  0x3c   : > { %2427 = sst [smem:[#allocation24_spill]] %s1986_s18 }
  0x3d   : > { %2424 = sst [smem:[#allocation23_spill]] %s2423_s9  ;;  %s1979_s6 = scalar_lea.hbm %s2425_s3, %s1915_s11 }
  0x3e   : > { %s1551_s8 = scalar_lea.hbm %s1979_s6, 1024  ;;  %s1556_s14 = scalar_lea.hbm %s2425_s3, 4096 }
  0x3f   : > { %p1552_p11 = scmp.ne.s32.totalorder %s1979_s6, %s1551_s8  ;;  %p1557_p1 = scmp.lt.u32.totalorder %s1979_s6, %s2425_s3 }
  0x40   : > { %p1558_p3 = scmp.lt.u32.totalorder %s1556_s14, %s1551_s8  ;;  %p1560_p7 = scmp.lt.u32.totalorder %s1551_s8, %s1979_s6 }
  0x41   : > { %p1554_p12 = pnand %p1552_p11, %p1942_p6 }
  0x42   : > { %p1559_p5 = por %p1558_p3, %p1557_p1 }
  0x43   : > { %p1555_p13 = pneg %p1554_p12 }
  0x44   : > { %p1561_p9 = por %p1560_p7, %p1559_p5 }
  0x46   : > { %p1562_p10 = pnand %p1561_p9, %p1555_p13 }
  0x48   : > { %1565 = shalt.err (!%p1562_p10)
}
  0x49   : > { %s1566_s1 = scalar_lea.vmem %s1982_s28, 1024  ;;  %s1807_s20 = smov [#allocation9]  }
  0x4a   : > { %p1567_p0 = scmp.ne.s32.totalorder %s1982_s28, %s1566_s1  ;;  %s1571_s15 = sshll.u32 %s1807_s20, 4  ;;  %s1572_s15 = int_to_ptr.vmem [resolvable:$false] %s1571_s15 }
  0x4b   : > { %s1573_s5 = scalar_lea.vmem %s1572_s15, 2048  ;;  %p1574_p12 = scmp.lt.s32.totalorder %s1982_s28, %s1572_s15 }
  0x4c   : > { %p1569_p2 = pnand %p1567_p0, %p1942_p6  ;;  %p1575_p8 = scmp.lt.s32.totalorder %s1573_s5, %s1566_s1 }
  0x4e   : > { %p1570_p11 = pneg %p1569_p2  ;;  %p1576_p1 = por %p1575_p8, %p1574_p12 }
  0x50   : > { %p1577_p3 = pnand %p1576_p1, %p1570_p11 }
  0x52   : > { %1580 = shalt.err (!%p1577_p3)
}
  0x53   : > { %s2428_s8 = smov 4   ;;  %s2429_s17 = smov 64  }
  0x54   : > { %s2430_s13 = smov 256   ;;  %s2014_s14 = sadd.s32 4294967295, %s1801_s7  }
  0x55   : > { %1381 = dma.hbm_to_vmem [thread:$0]  (!%p1927_p4), %s1979_s6, 1024, %s1982_s28, %s1986_s18, %s2430_s13, %s2429_s17, %s2428_s8  }
  0x56   : > { %s1163_s1 = sadd.s32 4294967294, %s1801_s7   ;;  %s37_s20 = sadd.s32 1, %s1793_s29 }
  0x57   : > { %s40_s15 = sadd.s32 1, %s1797_s30  ;;  %p38_p8 = scmp.ge.s32.totalorder %s37_s20, 4 }
  0x58   : > { %s47_s5 = sadd.s32 1, %s1781_s26  ;;  %p54_p13 = scmp.ne.s32.totalorder %s1781_s26, %s1777_s25 }
  0x59   : > { %p60_p5 = scmp.ne.s32.totalorder %s1777_s25, %s1773_s24  ;;  %s2478_s20 = smov (%p38_p8, %s37_s20), 0 }
  0x5a   : > { %2431 = sst [smem:[#allocation25_spill]] %s2478_s20  ;;  %s2480_s15 = smov (!%p38_p8, %s40_s15), %s1797_s30 }
  0x5b   : > { %p2432_p7 = scmp.eq.s32.totalorder %s1801_s7, 0  ;;  %p61_p10 = scmp.eq.s32.totalorder %s2014_s14, 0 }
  0x5c   : > { %p42_p0 = scmp.ge.s32.totalorder %s2480_s15, 2  ;;  %s70_s6 = ssub.s32 %s1793_s29, %s2478_s20 }
  0x5d   : > { %p2032_p9 = por %p2432_p7, %p54_p13  ;;  %p2042_p2 = por %p61_p10, %p60_p5 }
  0x5e   : > { %p71_p11 = scmp.eq.s32.totalorder %s70_s6, 0  ;;  %s2482_s15 = smov (%p42_p0, %s2480_s15), 0 }
  0x5f   : > { %s2434_s3 = scalar_select %p2042_p2, 1, 0 }
  0x60   : > { %2436 = sst [smem:[#allocation27_spill]] %s2482_s15  ;;  %s2437_s27 = sadd.s32 1, %s1769_s23 }
  0x61   : > { %2435 = sst [smem:[#allocation26_spill]] %s2434_s3  ;;  %s44_s18 = ssub.s32 %s1797_s30, %s2482_s15 }
  0x62   : > { %s2051_s9 = scalar_select %p71_p11, %s1769_s23, %s2437_s27  }
  0x63   : > { %p86_p12 = scmp.ne.s32.totalorder %s1765_s22, %s1761_s21  ;;  %p45_p1 = scmp.eq.s32.totalorder %s44_s18, 0 }
  0x64   : > { %2438 = sst [smem:[#allocation28_spill]] %s2051_s9  ;;  %p209_p3 = scmp.eq.s32.totalorder %s2014_s14, 7 }
  0x65   : > { %p2058_p8 = por %p86_p12, %p61_p10  ;;  %p215_p7 = scmp.eq.s32.totalorder %s1163_s1, 7 }
  0x66   : > { %s2063_s3 = scalar_select %p45_p1, %s1781_s26, %s47_s5  }
  0x67   : > { %s2439_s20 = scalar_select %p2058_p8, 1, 0 }
  0x68   : > { %2441 = sst [smem:[#allocation30_spill]] %s2063_s3  ;;  %p2068_p0 = por %p209_p3, %p54_p13 }
  0x69   : > { %2440 = sst [smem:[#allocation29_spill]] %s2439_s20  ;;  %p2075_p11 = por %p215_p7, %p60_p5 }
  0x6a   : > { %s2442_s6 = scalar_select %p2068_p0, 1, 0 }
  0x6b   : > { %s2443_s27 = scalar_select %p2075_p11, 1, 0 }
  0x6c   : > { %s238_s21 = sand.u32 1, %s1781_s26   ;;  %s1167_s18 = sshll.u32 %s1797_s30, 6 }
  0x6d   : > { %2444 = sst [smem:[#allocation31_spill]] %s2443_s27  ;;  %s1166_s15 = sshll.u32 %s238_s21, 2 }
  0x6e   : > { %s2084_s20 = scalar_lea.hbm %s2375_s0, %s1167_s18  ;;  %s242_s1 = scalar_lea.vmem [#allocation3], %s1166_s15 }
  0x6f   : > { %s249_s5 = sshll.u32 %s242_s1, 4  ;;  %p2445_p13 = scmp.lt.s32.totalorder %s1801_s7, 8  ;;  %s2094_s5 = int_to_ptr.vmem [resolvable:$true] %s249_s5 }
  0x70   : > { %s2100_s9 = scalar_lea.hbm %s2377_s2, %s1915_s11  ;;  %s239_s18 = scalar_lea.sflag [#allocation4], %s238_s21 }
  0x71   : > { %p2090_p5 = pnand %p2445_p13, %p2032_p9  ;;  %s1581_s26 = scalar_lea.hbm %s2084_s20, 64 }
  0x72   : > { %p1582_p10 = scmp.ne.s32.totalorder %s2084_s20, %s1581_s26  ;;  %s1586_s1 = scalar_lea.hbm %s2375_s0, 128 }
  0x73   : > { %p1583_p12 = pneg %p2090_p5  ;;  %p1587_p3 = scmp.lt.u32.totalorder %s2084_s20, %s2375_s0 }
  0x74   : > { %p1588_p7 = scmp.lt.u32.totalorder %s1586_s1, %s1581_s26  ;;  %p1590_p11 = scmp.lt.u32.totalorder %s1581_s26, %s2084_s20 }
  0x75   : > { %p1584_p9 = pnand %p1583_p12, %p1582_p10 }
  0x76   : > { %p1589_p13 = por %p1588_p7, %p1587_p3 }
  0x77   : > { %p1585_p1 = pneg %p1584_p9 }
  0x78   : > { %p1591_p0 = por %p1590_p11, %p1589_p13 }
  0x7a   : > { %p1592_p8 = pnand %p1591_p0, %p1585_p1 }
  0x7c   : > { %1595 = shalt.err (!%p1592_p8)
}
  0x7d   : > { %s1596_s30 = scalar_lea.vmem %s2094_s5, 64  ;;  %s1808_s11 = smov [#allocation3]  }
  0x7e   : > { %p1597_p10 = scmp.ne.s32.totalorder %s2094_s5, %s1596_s30  ;;  %s1601_s21 = sshll.u32 %s1808_s11, 4  ;;  %s1602_s21 = int_to_ptr.vmem [resolvable:$false] %s1601_s21 }
  0x7f   : > { %s1603_s24 = scalar_lea.vmem %s1602_s21, 128  ;;  %p1604_p4 = scmp.lt.s32.totalorder %s2094_s5, %s1602_s21 }
  0x80   : > { %p1599_p9 = pnand %p1597_p10, %p1583_p12  ;;  %p1605_p3 = scmp.lt.s32.totalorder %s1603_s24, %s1596_s30 }
  0x82   : > { %p1600_p2 = pneg %p1599_p9  ;;  %p1606_p7 = por %p1605_p3, %p1604_p4 }
  0x84   : > { %p1607_p11 = pnand %p1606_p7, %p1600_p2 }
  0x86   : > { %1610 = shalt.err (!%p1607_p11)
}
  0x87   : > { %1372 = dma.hbm_to_vmem [thread:$0]  (!%p2090_p5), %s2084_s20, 64, %s2094_s5, %s239_s18  }
  0x88   : > { %s280_s26 = scalar_lea.vmem [#allocation8], %s1917_s12  ;;  %s1224_s23 = sshll.u32 %s1793_s29, 10 }
  0x89   : > { %s286_s27 = sshll.u32 %s280_s26, 4  ;;  %s1611_s15 = scalar_lea.hbm %s2100_s9, 1024  ;;  %s2128_s27 = int_to_ptr.vmem [resolvable:$true] %s286_s27 }
  0x8a   : > { %p1612_p4 = scmp.ne.s32.totalorder %s2100_s9, %s1611_s15  ;;  %s1616_s1 = scalar_lea.hbm %s2377_s2, 4096 }
  0x8b   : > { %p1617_p0 = scmp.lt.u32.totalorder %s2100_s9, %s2377_s2  ;;  %p1618_p12 = scmp.lt.u32.totalorder %s1616_s1, %s1611_s15 }
  0x8c   : > { %p1614_p2 = pnand %p1612_p4, %p1942_p6  ;;  %p1620_p1 = scmp.lt.u32.totalorder %s1611_s15, %s2100_s9 }
  0x8d   : > { %p1619_p5 = por %p1618_p12, %p1617_p0 }
  0x8e   : > { %p1615_p8 = pneg %p1614_p2 }
  0x8f   : > { %p1621_p13 = por %p1620_p1, %p1619_p5 }
  0x91   : > { %p1622_p10 = pnand %p1621_p13, %p1615_p8 }
  0x93   : > { %1625 = shalt.err (!%p1622_p10)
}
  0x94   : > { %s1626_s20 = scalar_lea.vmem %s2128_s27, 1024  ;;  %s1809_s5 = smov [#allocation8]  }
  0x95   : > { %p1627_p9 = scmp.ne.s32.totalorder %s2128_s27, %s1626_s20  ;;  %s1631_s18 = sshll.u32 %s1809_s5, 4  ;;  %s1632_s18 = int_to_ptr.vmem [resolvable:$false] %s1631_s18 }
  0x96   : > { %s1633_s21 = scalar_lea.vmem %s1632_s18, 2048  ;;  %p1634_p11 = scmp.lt.s32.totalorder %s2128_s27, %s1632_s18 }
  0x97   : > { %p1629_p3 = pnand %p1627_p9, %p1942_p6  ;;  %p1635_p4 = scmp.lt.s32.totalorder %s1633_s21, %s1626_s20 }
  0x99   : > { %p1630_p7 = pneg %p1629_p3  ;;  %p1636_p2 = por %p1635_p4, %p1634_p11 }
  0x9b   : > { %p1637_p0 = pnand %p1636_p2, %p1630_p7 }
  0x9d   : > { %1640 = shalt.err (!%p1637_p0)
}
  0x9e   : > { %p2447_p8 = scmp.ne.s32.totalorder %s2421_s16, 0  ;;  %s2161_s15 = scalar_lea.hbm %s2379_s4, %s1224_s23 }
  0x9f   : > { %s320_s3 = scalar_lea.vmem [#allocation11], %s1917_s12  ;;  %s1641_s1 = scalar_lea.hbm %s2161_s15, 1024 }
  0xa0   : > { %1378 = dma.hbm_to_vmem [thread:$0]  (!%p2447_p8), %s2100_s9, 1024, %s2128_s27, %s1936_s19, %s2430_s13, %s2429_s17, %s2428_s8  }
  0xa1   : > { %s327_s28 = sshll.u32 %s320_s3, 4  ;;  %p1642_p12 = scmp.ne.s32.totalorder %s2161_s15, %s1641_s1  ;;  %s2164_s28 = int_to_ptr.vmem [resolvable:$true] %s327_s28 }
  0xa2   : > { %s1646_s9 = scalar_lea.hbm %s2379_s4, 4096  ;;  %p1647_p13 = scmp.lt.u32.totalorder %s2161_s15, %s2379_s4 }
  0xa3   : > { %p1644_p5 = pnand %p1642_p12, %p1942_p6  ;;  %p1648_p10 = scmp.lt.u32.totalorder %s1646_s9, %s1641_s1 }
  0xa4   : > { %p1650_p3 = scmp.lt.u32.totalorder %s1641_s1, %s2161_s15 }
  0xa5   : > { %p1645_p1 = pneg %p1644_p5  ;;  %p1649_p9 = por %p1648_p10, %p1647_p13 }
  0xa7   : > { %p1651_p7 = por %p1650_p3, %p1649_p9 }
  0xa9   : > { %p1652_p11 = pnand %p1651_p7, %p1645_p1 }
  0xab   : > { %1655 = shalt.err (!%p1652_p11)
}
  0xac   : > { %s1656_s12 = scalar_lea.vmem %s2164_s28, 1024  ;;  %s1810_s30 = smov [#allocation11]  }
  0xad   : > { %p1657_p4 = scmp.ne.s32.totalorder %s2164_s28, %s1656_s12  ;;  %s1661_s11 = sshll.u32 %s1810_s30, 4  ;;  %s1662_s11 = int_to_ptr.vmem [resolvable:$false] %s1661_s11 }
  0xae   : > { %s1663_s20 = scalar_lea.vmem %s1662_s11, 2048  ;;  %p1664_p12 = scmp.lt.s32.totalorder %s2164_s28, %s1662_s11 }
  0xaf   : > { %p1659_p2 = pnand %p1657_p4, %p1942_p6  ;;  %p1665_p5 = scmp.lt.s32.totalorder %s1663_s20, %s1656_s12 }
  0xb1   : > { %p1660_p0 = pneg %p1659_p2  ;;  %p1666_p13 = por %p1665_p5, %p1664_p12 }
  0xb3   : > { %p1667_p10 = pnand %p1666_p13, %p1660_p0 }
  0xb5   : > { %1670 = shalt.err (!%p1667_p10)
}
  0xb6   : > { %s2448_s5 = sld [smem:[#allocation24_spill]]  ;;  %s2449_s10 = sld [smem:[#allocation23_spill]] }
  0xbc   : > { %1384 = dma.hbm_to_vmem [thread:$0]  (!%p2447_p8), %s2161_s15, 1024, %s2164_s28, %s2448_s5, %s2429_s17, %s2429_s17, %s2428_s8  }
  0xbd   : > { %p2450_p6 = scmp.ne.s32.totalorder %s2449_s10, 0 }
  0xbe   : > { %s2451_s18 = sld [smem:[#allocation26_spill]] (!%p2450_p6)  ;;  %s2194_s21 = sand.u32 (!%p2450_p6), 1, %s1777_s25  }
  0xbf   : > { %339 = sbr.rel (%p2450_p6) target bundleno = 1476 (0x5c4), region = 44  ;;  %s1178_s24 = sshll.u32 (!%p2450_p6), %s2194_s21, 2 }
  0xc0   : > { %s342_s26 = scalar_lea.sflag (!%p2450_p6), [#allocation4], %s2194_s21  ;;  %s2198_s3 = scalar_lea.vmem (!%p2450_p6), [#allocation3], %s1178_s24 }
  0xc4   : > { %p2452_p1 = scmp.ne.s32.totalorder (!%p2450_p6), %s2451_s18, 0 }
  0xc6   : > { %1744 = dma.done.wait (%p2452_p1), %s342_s26, 64  }
  0xc7   : > { %1746 = vsyncadd (%p2452_p1), %s342_s26, 4294967232  ;;  %s2453_s16 = sld [smem:[#allocation29_spill]]  ;;  %s350_s8 = sand.u32 1, %s2014_s14  }
  0xc8   : > { %s352_s17 = sand.u32 1, %s1765_s22   ;;  %s351_s28 = scalar_lea.sflag [#allocation7], %s350_s8 }
  0xc9   : > { %s1179_s15 = sshll.u32 %s352_s17, 6 }
  0xca   : > { %s2206_s1 = scalar_lea.vmem [#allocation6], %s1179_s15 }
  0xcd   : > { %p2454_p8 = scmp.ne.s32.totalorder %s2453_s16, 0 }
  0xcf   : > { %1748 = dma.done.wait (%p2454_p8), %s351_s28, 2048  }
  0xd0   : > { %1750 = vsyncadd (%p2454_p8), %s351_s28, 4294965248  ;;  %s2212_s19 = scalar_lea.vmem [#allocation8], %s1179_s15  ;;  %s369_s13 = scalar_lea.sflag [#allocation10], %s350_s8 }
  0xd1   : > { %s2214_s9 = scalar_lea.vmem [#allocation9], %s1179_s15 }
  0xd2   : > { %1752 = dma.done.wait (%p2454_p8), %s369_s13, 2048  }
  0xd3   : > { %1754 = vsyncadd (%p2454_p8), %s369_s13, 4294965248  ;;  %s1183_s14 = sshll.u32 %s2194_s21, 3  ;;  %s2221_s27 = scalar_lea.vmem [#allocation11], %s1179_s15 }
  0xd4   : > { %s2223_s23 = scalar_lea.vmem [#allocation12], %s1183_s14  ;;  %s2455_s12 = sld [smem:[#allocation20_spill]] }
  0xda   : > { %p1184_p9 = scmp.ne.s32.totalorder %s2455_s12, 0 }
  0xdb   : > { %v1811_v0 = vmov (!%p1184_p9), 0.0  }
  0xdc   : > { %435 = sbr.rel (%p1184_p9) target bundleno = 227 (0xe3), region = 68  ;;  %436 = vst [vmem:[#allocation2] sm:$0xff] (!%p1184_p9), %v1811_v0 }
  0xe3 PF: > { %v1485_v1 = vld [vmem:[%s2212_s19] sm:$0xff]   ;;  %v1812_v2 = vmov 0.0   ;;  %v1486_v3 = vld [vmem:[%s2212_s19 + $0x8] sm:$0xff]   ;;  %vm1813_vm0 = vmmov 0   ;;  %v1488_v6 = vld [vmem:[%s2212_s19 + $0x10] sm:$0xff]   ;;  %vm815_vm1 = vcmask 1043456   ;;  %v793_v43 = vlaneseq }
  0xe4   : > { %1285 = vmatprep.subr.bf16.mxu1 %v1812_v2  ;;  %1265 = vmatprep.subr.bf16.mxu0 %v1812_v2  ;;  %v1487_v4 = vld [vmem:[%s2206_s1] sm:$0xff]   ;;  %v1489_v5 = vld [vmem:[%s2206_s1 + $0x8] sm:$0xff]   ;;  %v1491_v7 = vld [vmem:[%s2206_s1 + $0x10] sm:$0xff]   ;;  %vm799_vm3 = vcmask 64512   ;;  %s2456_s30 = sld [smem:[#allocation20_spill]] }
  0xe5   : > { %1286 = vmatpush3.bf16.msra.mxu1 %v1485_v1  ;;  %1301 = vmatprep.mubr.msk.bf16.mxu1 %vm1813_vm0, %v1812_v2  ;;  %v1490_v8 = vld [vmem:[%s2212_s19 + $0x18] sm:$0xff]   ;;  %v1492_v10 = vld [vmem:[%s2212_s19 + $0x20] sm:$0xff]   ;;  %v1494_v12 = vld [vmem:[%s2212_s19 + $0x28] sm:$0xff]   ;;  %v794_v44 = vshrl.u32 %v793_v43, 7  ;;  %v796_v45 = vand.u32 127, %v793_v43 }
  0xe6   : > { %1287 = vmatprep.subr.bf16.mxu1 %v1812_v2  ;;  %1281 = vmatprep.mubr.msk.bf16.mxu0 %vm1813_vm0, %v1812_v2  ;;  %v1493_v9 = vld [vmem:[%s2206_s1 + $0x18] sm:$0xff]   ;;  %v1495_v11 = vld [vmem:[%s2206_s1 + $0x20] sm:$0xff]   ;;  %v1497_v13 = vld [vmem:[%s2206_s1 + $0x28] sm:$0xff]  }
  0xe7   : > { %1266 = vmatpush3.bf16.msra.mxu0 %v1487_v4  ;;  %v1496_v14 = vld [vmem:[%s2212_s19 + $0x30] sm:$0xff]   ;;  %v1498_v15 = vld [vmem:[%s2212_s19 + $0x38] sm:$0xff]   ;;  %v1501_v19 = vld [vmem:[%s2214_s9] sm:$0xff]   ;;  %vm797_vm2 = vcmp.gt.s32.totalorder %v796_v45, %v794_v44 }
  0xe8   : > { %1267 = vmatprep.subr.bf16.mxu0 %v1812_v2  ;;  %v1499_v16 = vld [vmem:[%s2206_s1 + $0x30] sm:$0xff]   ;;  %v1500_v17 = vld [vmem:[%s2206_s1 + $0x38] sm:$0xff]   ;;  %v1502_v20 = vld [vmem:[%s2214_s9 + $0x8] sm:$0xff]  }
  0xe9   : > { %1288 = vmatpush3.bf16.msra.mxu1 %v1486_v3  ;;  %v437_v18 = vld [vmem:[%s2198_s3] sm:$0xf]  ;;  %v1503_v21 = vld [vmem:[%s2214_s9 + $0x10] sm:$0xff]   ;;  %v1505_v23 = vld [vmem:[%s2214_s9 + $0x20] sm:$0xff]  }
  0xea   : > { %1289 = vmatprep.subr.bf16.mxu1 %v1812_v2  ;;  %v1504_v22 = vld [vmem:[%s2214_s9 + $0x18] sm:$0xff]   ;;  %v1506_v24 = vld [vmem:[%s2214_s9 + $0x28] sm:$0xff]   ;;  %v1507_v25 = vld [vmem:[%s2214_s9 + $0x30] sm:$0xff]   ;;  %p1218_p3 = scmp.ne.s32.totalorder %s2456_s30, 3 }
  0xeb   : > { %1268 = vmatpush3.bf16.msra.mxu0 %v1489_v5  ;;  %v1508_v26 = vld [vmem:[%s2214_s9 + $0x38] sm:$0xff]   ;;  %v1509_v60 = vld [vmem:[%s2221_s27] sm:$0xff]   ;;  %v1510_v62 = vld [vmem:[%s2221_s27 + $0x8] sm:$0xff]   ;;  %s2457_s5 = sld [smem:[#allocation34_spill]] (!%p1218_p3) }
  0xec   : > { %1269 = vmatprep.subr.bf16.mxu0 %v1812_v2  ;;  %v1511_v63 = vld [vmem:[%s2221_s27 + $0x10] sm:$0xff]   ;;  %v1512_v0 = vld [vmem:[%s2221_s27 + $0x18] sm:$0xff]   ;;  %v1513_v1 = vld [vmem:[%s2221_s27 + $0x20] sm:$0xff]  }
  0xed   : > { %1290 = vmatpush3.bf16.msra.mxu1 %v1488_v6  ;;  %v1514_v3 = vld [vmem:[%s2221_s27 + $0x28] sm:$0xff]   ;;  %v1515_v4 = vld [vmem:[%s2221_s27 + $0x30] sm:$0xff]   ;;  %v1516_v5 = vld [vmem:[%s2221_s27 + $0x38] sm:$0xff]  }
  0xee   : > { %1291 = vmatprep.subr.bf16.mxu1 %v1812_v2 }
  0xef   : > { %1270 = vmatpush3.bf16.msra.mxu0 %v1491_v7 }
  0xf0   : > { %1271 = vmatprep.subr.bf16.mxu0 %v1812_v2 }
  0xf1   : > { %1292 = vmatpush3.bf16.msra.mxu1 %v1490_v8 }
  0xf2   : > { %1293 = vmatprep.subr.bf16.mxu1 %v1812_v2 }
  0xf3   : > { %1272 = vmatpush3.bf16.msra.mxu0 %v1493_v9 }
  0xf4   : > { %1273 = vmatprep.subr.bf16.mxu0 %v1812_v2 }
  0xf5   : > { %1294 = vmatpush3.bf16.msra.mxu1 %v1492_v10 }
  0xf6   : > { %1295 = vmatprep.subr.bf16.mxu1 %v1812_v2 }
  0xf7   : > { %1274 = vmatpush3.bf16.msra.mxu0 %v1495_v11  ;;  %v859_v11 = vld [vmem:[#allocation2] sm:$0xff] }
  0xf8   : > { %1275 = vmatprep.subr.bf16.mxu0 %v1812_v2 }
  0xf9   : > { %1296 = vmatpush3.bf16.msra.mxu1 %v1494_v12 }
  0xfa   : > { %1297 = vmatprep.subr.bf16.mxu1 %v1812_v2 }
  0xfb   : > { %1276 = vmatpush3.bf16.msra.mxu0 %v1497_v13 }
  0xfc   : > { %1277 = vmatprep.subr.bf16.mxu0 %v1812_v2 }
  0xfd   : > { %1298 = vmatpush3.bf16.msra.mxu1 %v1496_v14 }
  0xfe   : > { %1299 = vmatprep.subr.bf16.mxu1 %v1812_v2 }
  0xff   : > { %1278 = vmatpush3.bf16.msra.mxu0 %v1499_v16 }
 0x100   : > { %1279 = vmatprep.subr.bf16.mxu0 %v1812_v2 }
 0x101   : > { %1300 = vmatpush3.bf16.msra.mxu1 %v1498_v15 }
 0x102   : > { %1331 = vmatprep.subr.bf16.mxu1 %v1812_v2 }
 0x103   : > { %1280 = vmatpush3.bf16.msra.mxu0 %v1500_v17 }
 0x104   : > { %1302 = vmatmul.mubr.bf16.vlgmr.msra.gmra.mrb[0].mxu1 %v437_v18  ;;  %1305 = vmatprep.subr.bf16.mxu0 %v1812_v2 }
 0x105   : > { %1333 = vmatprep.mubr.msk.bf16.mxu1 %vm1813_vm0, %v1812_v2 }
 0x106   : > { %1282 = vmatmul.mubr.bf16.vlgmr.msra.gmra.mrb[0].mxu0 %v437_v18 }
 0x107   : > { %1306 = vmatpush3.bf16.msra.mxu0 %v1501_v19  ;;  %1321 = vmatprep.mubr.msk.bf16.mxu0 %vm1813_vm0, %v1812_v2 }
 0x108   : > { %1307 = vmatprep.subr.bf16.mxu0 %v1812_v2 }
 0x10b   : > { %1308 = vmatpush3.bf16.msra.mxu0 %v1502_v20 }
 0x10c   : > { %1309 = vmatprep.subr.bf16.mxu0 %v1812_v2 }
 0x10f   : > { %1310 = vmatpush3.bf16.msra.mxu0 %v1503_v21 }
 0x110   : > { %1311 = vmatprep.subr.bf16.mxu0 %v1812_v2 }
 0x113   : > { %1312 = vmatpush3.bf16.msra.mxu0 %v1504_v22 }
 0x114   : > { %1313 = vmatprep.subr.bf16.mxu0 %v1812_v2 }
 0x117   : > { %1314 = vmatpush3.bf16.msra.mxu0 %v1505_v23 }
 0x118   : > { %1315 = vmatprep.subr.bf16.mxu0 %v1812_v2 }
 0x11b   : > { %1316 = vmatpush3.bf16.msra.mxu0 %v1506_v24 }
 0x11c   : > { %1317 = vmatprep.subr.bf16.mxu0 %v1812_v2 }
 0x11f   : > { %1318 = vmatpush3.bf16.msra.mxu0 %v1507_v25 }
 0x120   : > { %1319 = vmatprep.subr.bf16.mxu0 %v1812_v2 }
 0x123   : > { %1320 = vmatpush3.bf16.msra.mxu0 %v1508_v26 }
 0x124   : > { %1325 = vmatprep.subr.bf16.mxu0 %v1812_v2 }
 0x126   : > { %1322 = vmatmul.mubr.bf16.vlgmr.msra.gmra.mrb[4].mxu0 %v437_v18 }
 0x127   : > { %1327 = vmatprep.mubr.msk.bf16.mxu0 %vm1813_vm0, %v1812_v2 }
 0x1d7   : > { %v640_v27 = vpop.f32.mrb[0].mxu1 }
 0x1d8   : > { %v751_v28 = vpack.c.bf16 %v640_v27, %v640_v27  ;;  %v1303_v29 = vpop.f32.mrb[1].mxu1 }
 0x1d9   : > { %v643_v30 = vpop.f32.mrb[2].mxu1  ;;  %v536_v31 = vpop.f32.mrb[0].mxu0 }
 0x1da   : > { %v1304_v32 = vpop.f32.mrb[3].mxu1  ;;  %1326 = vmatpush3.bf16.xpose.msra.mxu0 %v751_v28  ;;  %v1283_v33 = vpop.f32.mrb[1].mxu0  ;;  %v750_v36 = vpack.c.bf16 %v536_v31, %v536_v31 }
 0x1db   : > { %v539_v34 = vpop.f32.mrb[2].mxu0 }
 0x1dc   : > { %v1284_v35 = vpop.f32.mrb[3].mxu0 }
 0x1e1   : > { %1328 = vmatmul.mubr.bf16.vlgmr.msra.gmra.mrb[8].mxu0 %v750_v36 }
 0x1f9   : > { %v744_v37 = vpop.f32.mrb[4].mxu0 }
 0x1fa   : > { %v752_v38 = vpack.c.bf16 %v744_v37, %v744_v37  ;;  %v1323_v39 = vpop.f32.mrb[5].mxu0 }
 0x1fb   : > { %v747_v40 = vpop.f32.mrb[6].mxu0 }
 0x1fc   : > { %v817_v41 = vsel %vm815_vm1, %v752_v38, 0  ;;  %v1324_v42 = vpop.f32.mrb[7].mxu0 }
 0x1fd   : > { %1332 = vmatpush3.bf16.msra.mxu1 %v817_v41 }
 0x1fe   : > { %1337 = vmatprep.subr.bf16.mxu1 %v1812_v2 }
 0x2b4   : > { %v787_v46 = vpop.f32.mrb[8].mxu0 }
 0x2b5   : > { %v798_v47 = vsel %vm797_vm2, -1e+30, %v787_v46  ;;  %v1329_v48 = vpop.f32.mrb[9].mxu0 }
 0x2b6   : > { %v790_v49 = vpop.f32.mrb[10].mxu0  ;;  %v800_v50 = vsel %vm799_vm3, %v798_v47, -inf }
 0x2b7   : > { %801 = vmax.xlane.f32.xlu0 %v800_v50  ;;  %v1330_v51 = vpop.f32.mrb[11].mxu0 }
 0x344   : > { %v802_v52 = vpop.xlane.xlu0 %801 }
 0x345   : > { %v803_v53 = vsub.f32 %v798_v47, %v802_v52 }
 0x347   : > { %v804_v54 = vmul.f32 1.442695, %v803_v53 }
 0x349   : > { %1517 = vpow2.f32 %v804_v54 }
 0x353   : > { %v1518_v55 = vpop.eup %1517 }
 0x354   : > { %v806_v56 = vsel %vm799_vm3, %v1518_v55, 0.0 }
 0x355   : > { %807 = vadd.xlane.f32.xlu0 %v806_v56 }
 0x3e2   : > { %v808_v57 = vpop.xlane.xlu0 %807 }
 0x3e3   : > { %1519 = vrcp.f32 %v808_v57 }
 0x3ed   : > { %v1520_v58 = vpop.eup %1519 }
 0x3ee   : > { %v810_v59 = vmul.f32 %v1520_v58, %v1518_v55 }
 0x3f0   : > { %v811_v61 = vpack.c.bf16 %v810_v59, %v810_v59 }
 0x3f2   : > { %1334 = vmatmul.mubr.msk.bf16.vlgmr.msra.gmra.mrb[4].mxu1 %vm799_vm3, %v811_v61 }
 0x3f3   : > { %1338 = vmatpush3.bf16.msra.mxu1 %v1509_v60  ;;  %1353 = vmatprep.mubr.msk.bf16.mxu1 %vm1813_vm0, %v1812_v2 }
 0x3f4   : > { %1339 = vmatprep.subr.bf16.mxu1 %v1812_v2 }
 0x3f7   : > { %1340 = vmatpush3.bf16.msra.mxu1 %v1510_v62 }
 0x3f8   : > { %1341 = vmatprep.subr.bf16.mxu1 %v1812_v2 }
 0x3fb   : > { %1342 = vmatpush3.bf16.msra.mxu1 %v1511_v63 }
 0x3fc   : > { %1343 = vmatprep.subr.bf16.mxu1 %v1812_v2 }
 0x3ff   : > { %1344 = vmatpush3.bf16.msra.mxu1 %v1512_v0 }
 0x400   : > { %1345 = vmatprep.subr.bf16.mxu1 %v1812_v2 }
 0x403   : > { %1346 = vmatpush3.bf16.msra.mxu1 %v1513_v1 }
 0x404   : > { %1347 = vmatprep.subr.bf16.mxu1 %v1812_v2 }
 0x407   : > { %1348 = vmatpush3.bf16.msra.mxu1 %v1514_v3 }
 0x408   : > { %1349 = vmatprep.subr.bf16.mxu1 %v1812_v2 }
 0x40b   : > { %1350 = vmatpush3.bf16.msra.mxu1 %v1515_v4 }
 0x40c   : > { %1351 = vmatprep.subr.bf16.mxu1 %v1812_v2  ;;  %v1219_v2 = vld [vmem:[%s2457_s5] ss:$0 sm:$0xff] (!%p1218_p3) }
 0x40f   : > { %1352 = vmatpush3.bf16.msra.mxu1 %v1516_v5 }
 0x4c5   : > { %v853_v6 = vpop.f32.mrb[4].mxu1 }
 0x4c6   : > { %v860_v7 = vpack.c.bf16 %v853_v6, %v853_v6  ;;  %v1335_v8 = vpop.f32.mrb[5].mxu1 }
 0x4c7   : > { %v856_v9 = vpop.f32.mrb[6].mxu1 }
 0x4c8   : > { %v1336_v10 = vpop.f32.mrb[7].mxu1  ;;  %1354 = vmatmul.mubr.bf16.vlgmr.msra.gmra.mrb[8].mxu1 %v860_v7 }
 0x598   : > { %970 = sbr.rel (%p1218_p3) target bundleno = 1449 (0x5a9), region = 72 }
 0x59b   : > { %v959_v12 = vpop.f32.mrb[8].mxu1 }
 0x59c   : > { %v965_v13 = vadd.f32 %v959_v12, %v859_v11  ;;  %v1355_v14 = vpop.f32.mrb[9].mxu1 }
 0x59d   : > { %v962_v15 = vpop.f32.mrb[10].mxu1 }
 0x59e   : > { %966 = vst [vmem:[#allocation2] sm:$0xff] %v965_v13  ;;  %v1356_v16 = vpop.f32.mrb[11].mxu1 }
 0x5a5   : > { %v971_v17 = vld [vmem:[#allocation2] sm:$0xff] }
 0x5a6   : > { %v979_v18 = vadd.f32 %v1219_v2, %v971_v17 }
 0x5a8   : > { %980 = vst [vmem:[%s2223_s23] sm:$0xff] %v979_v18 }
 0x5a9 PF: > { %s2458_s10 = sld [smem:[#allocation21_spill]]  ;;  %s2459_s3 = sld [smem:[#allocation35_spill]] }
 0x5aa   : > { %s995_s8 = sshll.u32 %s2223_s23, 4  ;;  %s982_s17 = scalar_lea.sflag [#allocation5], %s2194_s21  ;;  %s996_s8 = int_to_ptr.vmem [resolvable:$true] %s995_s8 }
 0x5ab   : > { %s1671_s15 = scalar_lea.vmem %s996_s8, 128  ;;  %p2460_p11 = scmp.ne.s32.totalorder %s2442_s6, 0 }
 0x5ac   : > { %p1672_p7 = scmp.ne.s32.totalorder %s996_s8, %s1671_s15  ;;  %s1814_s28 = smov [#allocation12]  }
 0x5ad   : > { %s1675_s1 = sshll.u32 %s1814_s28, 4  ;;  %s1676_s1 = int_to_ptr.vmem [resolvable:$false] %s1675_s1 }
 0x5ae   : > { %p1673_p4 = pnand %p1672_p7, %p2460_p11  ;;  %s1677_s19 = scalar_lea.vmem %s1676_s1, 256 }
 0x5af   : > { %s1221_s18 = sshll.u32 %s2458_s10, 7  ;;  %p1678_p0 = scmp.lt.s32.totalorder %s996_s8, %s1676_s1 }
 0x5b0   : > { %s2317_s16 = scalar_lea.hbm %s2459_s3, %s1221_s18  ;;  %p1674_p2 = pneg %p1673_p4 }
 0x5b1   : > { %p1679_p12 = scmp.lt.s32.totalorder %s1677_s19, %s1671_s15 }
 0x5b3   : > { %p1680_p5 = por %p1679_p12, %p1678_p0 }
 0x5b5   : > { %p1681_p13 = pnand %p1680_p5, %p1674_p2 }
 0x5b7   : > { %1684 = shalt.err (!%p1681_p13)
}
 0x5b8   : > { %s1685_s21 = scalar_lea.hbm %s2317_s16, 128  ;;  %s1689_s14 = scalar_lea.hbm %s2459_s3, 256 }
 0x5b9   : > { %p1686_p10 = scmp.ne.s32.totalorder %s2317_s16, %s1685_s21  ;;  %p1690_p8 = scmp.lt.u32.totalorder %s2317_s16, %s2459_s3 }
 0x5ba   : > { %p1691_p9 = scmp.lt.u32.totalorder %s1689_s14, %s1685_s21  ;;  %p1693_p7 = scmp.lt.u32.totalorder %s1685_s21, %s2317_s16 }
 0x5bb   : > { %p1687_p6 = pnand %p1686_p10, %p2460_p11 }
 0x5bc   : > { %p1692_p3 = por %p1691_p9, %p1690_p8 }
 0x5bd   : > { %p1688_p1 = pneg %p1687_p6 }
 0x5be   : > { %p1694_p4 = por %p1693_p7, %p1692_p3 }
 0x5c0   : > { %p1695_p2 = pnand %p1694_p4, %p1688_p1 }
 0x5c2   : > { %1698 = shalt.err (!%p1695_p2)
}
 0x5c3   : > { %1367 = dma.vmem_to_hbm [thread:$0]  (%p2460_p11), %s996_s8, 128, %s2317_s16, %s982_s17  }
 0x5c4 PF: > { %s2461_s12 = sld [smem:[#allocation18_spill]]  ;;  %s2462_s30 = sld [smem:[#allocation31_spill]] }
 0x5c5   : > { %p1390_p0 = scmp.ge.s32.totalorder %s1801_s7, 2 }
 0x5ca   : > { %s1007_s11 = sand.u32 1, %s2461_s12   ;;  %p2463_p12 = scmp.ne.s32.totalorder %s2462_s30, 0 }
 0x5cb   : > { %s1008_s20 = scalar_lea.sflag [#allocation5], %s1007_s11 }
 0x5cc   : > { %p1386_p5 = pnand %p1390_p0, %p2463_p12 }
 0x5ce   : > { %1756 = dma.done.wait (!%p1386_p5), %s1008_s20, 128  }
 0x5cf   : > { %1758 = vsyncadd (!%p1386_p5), %s1008_s20, 4294967168  ;;  %s28_s7 = sadd.s32 1, %s1801_s7   ;;  %s2464_s5 = sld [smem:[#allocation17_spill]] }
 0x5d0   : > { %p25_p13 = scmp.ge.s32.totalorder %s28_s7, 10   ;;  %s2465_s23 = sld [smem:[#allocation28_spill]] }
 0x5d1   : > { %s2466_s6 = sld [smem:[#allocation19_spill]]  ;;  %s2467_s26 = sld [smem:[#allocation30_spill]] }
 0x5d2   : > { %s2468_s28 = sld [smem:[#allocation22_spill]]  ;;  %s2469_s10 = sld [smem:[#allocation25_spill]] }
 0x5d3   : > { %s2470_s30 = sld [smem:[#allocation27_spill]]  ;;  %s2471_s21 = smov %s1765_s22 }
 0x5d4   : > { %s2473_s24 = smov %s1777_s25  ;;  %s2475_s27 = smov %s1793_s29 }
 0x5d5   : > { %s2472_s22 = smov %s2464_s5  ;;  %27 = sbr.rel (!%p25_p13) target bundleno = 18 (0x12), region = 145 }
 0x5d7   : > { %s2474_s25 = smov %s2466_s6 }
 0x5d8   : > { %s2476_s29 = smov %s2469_s10 }
 0x5dc   :  { %1013 = vsyncpa [#allocation4], 1 }
 0x5dd   :  { %1015 = vsyncpa [#allocation4 + $0x1], 1 }
 0x5de   :  { %1016 = vsyncpa [#allocation7], 1 }
 0x5df   :  { %1018 = vsyncpa [#allocation7 + $0x1], 1 }
 0x5e0   :  { %1019 = vsyncpa [#allocation10], 1 }
 0x5e1   :  { %1021 = vsyncpa [#allocation10 + $0x1], 1 }
 0x5e2   :  { %1022 = vsyncpa [#allocation5], 1 }
 0x5e3   :  { %1024 = vsyncpa [#allocation5 + $0x1], 1 }

</bundles_post_ra>
